<compile_context>
chip_gen: v7x
topology: tpu7x:2x2x1
jax: 0.10.0
libtpu: 0.0.40
codegen_flags: <defaults>
</compile_context>

<pallas_src>
import functools

import jax
import jax.numpy as jnp
from jax.experimental import pallas as pl
from jax.experimental.pallas import tpu as pltpu


def _round_up(x, m):
    return ((x + m - 1) // m) * m


def _cdiv(a, b):
    return (a + b - 1) // b


def _tpu_vmem_capacity_bytes():
    """Best-effort physical VMEM size; conservative (v7x) default on failure."""
    try:
        info = pltpu.get_tpu_info()
        cap = getattr(info, "vmem_capacity_bytes", None)
        if cap:
            return int(cap)
    except Exception:
        pass
    try:
        kind = jax.devices()[0].device_kind.lower()
        if "v5" in kind or "v6" in kind:
            return 128 * 1024 * 1024
    except Exception:
        pass
    return 64 * 1024 * 1024


def _jaccard_kernel(preds_ref, targets_ref, jac_ref,
                    inter_acc, p_acc, t_acc, *, eps, L, tl, mask_lanes):
    """Grid step (i, l): one (tn, tl) tile of rows i, L-chunk l.

    preds_ref, targets_ref : (tn, tl) VMEM tiles
    jac_ref                : (tn, 1)  per-row jaccard (resident across l)
    inter_acc, p_acc, t_acc: (tn, 1)  f32 VMEM partial-sum accumulators
    """
    l = pl.program_id(1)

    @pl.when(l == 0)
    def _():
        inter_acc[...] = jnp.zeros_like(inter_acc)
        p_acc[...] = jnp.zeros_like(p_acc)
        t_acc[...] = jnp.zeros_like(t_acc)

    x = preds_ref[...].astype(jnp.float32)
    t = targets_ref[...].astype(jnp.float32)

    # sigmoid(x) = 0.5 * tanh(0.5 * x) + 0.5  -> one EUP transcendental.
    p = 0.5 * jnp.tanh(0.5 * x) + 0.5

    if mask_lanes:  # static: only emitted when L % tl != 0
        lane = jax.lax.broadcasted_iota(jnp.int32, p.shape, 1)
        valid = (l * tl + lane) < L
        # where (not multiply) so OOB garbage / NaN cannot propagate.
        p = jnp.where(valid, p, 0.0)
        t = jnp.where(valid, t, 0.0)

    inter_acc[...] += jnp.sum(p * t, axis=1, keepdims=True)
    p_acc[...] += jnp.sum(p, axis=1, keepdims=True)
    t_acc[...] += jnp.sum(t, axis=1, keepdims=True)

    @pl.when(l == pl.num_programs(1) - 1)
    def _():
        inter = inter_acc[...]
        union = p_acc[...] + t_acc[...] - inter
        jac_ref[...] = (inter + eps) / (union + eps)


def jaccard_loss_pallas(preds, targets, eps=1e-7,
                        max_block_bytes=None, max_rows_per_block=256):
    """preds, targets: (B, C, *spatial). Returns scalar float32 loss."""
    B, C = preds.shape[0], preds.shape[1]
    N = B * C
    L = 1
    for d in preds.shape[2:]:
        L *= int(d)

    preds2d = preds.reshape(N, L)      # views, no HBM copy
    targets2d = targets.reshape(N, L)

    p_size = jnp.dtype(preds2d.dtype).itemsize
    t_size = jnp.dtype(targets2d.dtype).itemsize
    max_itemsize = max(p_size, t_size)     # budget with the wider dtype
    min_itemsize = min(p_size, t_size)
    # Sublane alignment for the most-packed dtype (8 f32 / 16 bf16 / 32 int8).
    row_align = 8 * max(1, 4 // min_itemsize)

    # Chip-adaptive budgets: big tiles on 128 MiB-VMEM chips (v5e/v6e),
    # capped tiles on v7x (64 MiB VMEM per TensorCore).
    vmem_cap = _tpu_vmem_capacity_bytes()
    big_vmem = vmem_cap >= 128 * 1024 * 1024
    if max_block_bytes is None:
        max_block_bytes = (12 if big_vmem else 5) * 1024 * 1024
    vmem_limit_cap = (96 if big_vmem else 44) * 1024 * 1024

    N_tiles = _round_up(N, row_align)
    L_tiles = _round_up(L, 128)

    # Row tile: aim for >= 2 row blocks (feeds both v7x TensorCores), capped.
    tn_half = _round_up(_cdiv(N, 2), row_align)
    tn = max(row_align, min(tn_half, max_rows_per_block, N_tiles))

    # Lane tile: fit the byte budget given tn; take all of L if it fits.
    tl_budget = max(128, (max_block_bytes // (tn * max_itemsize)) // 128 * 128)
    tl = min(L_tiles, tl_budget)

    # Long-N / short-L inputs: grow the row tile toward the byte budget
    # (still keeping >= 2 row blocks when possible).
    if tl == L_tiles:
        tn_budget = (max_block_bytes // (tl * max_itemsize)) // row_align * row_align
        tn = max(row_align, min(max(tn, tn_budget), tn_half, N_tiles, 1024))

    grid = (_cdiv(N, tn), _cdiv(L, tl))
    mask_lanes = (L % tl) != 0   # static; only the last l block has invalid lanes

    # VMEM: 2 pipeline buffers per input + tiny scratch/output, with headroom.
    pipeline_bytes = 2 * tn * tl * (p_size + t_size)
    vmem_limit = int(min(max(pipeline_bytes + (4 << 20), 32 * 1024 * 1024),
                         vmem_limit_cap))

    kernel = functools.partial(_jaccard_kernel, eps=float(eps), L=L, tl=tl,
                               mask_lanes=mask_lanes)

    jac = pl.pallas_call(
        kernel,
        out_shape=jax.ShapeDtypeStruct((N, 1), jnp.float32),
        grid_spec=pltpu.PrefetchScalarGridSpec(
            num_scalar_prefetch=0,
            grid=grid,
            in_specs=[
                pl.BlockSpec((tn, tl), lambda i, l: (i, l)),
                pl.BlockSpec((tn, tl), lambda i, l: (i, l)),
            ],
            out_specs=pl.BlockSpec((tn, 1), lambda i, l: (i, 0)),
            scratch_shapes=[
                pltpu.VMEM((tn, 1), jnp.float32),
                pltpu.VMEM((tn, 1), jnp.float32),
                pltpu.VMEM((tn, 1), jnp.float32),
            ],
        ),
        compiler_params=pltpu.CompilerParams(
            dimension_semantics=("parallel", "arbitrary"),
            vmem_limit_bytes=vmem_limit,
        ),
    )(preds2d, targets2d)

    # Tiny final reduction stays in XLA.
    return (1.0 - jnp.mean(jac)).astype(jnp.float32)


def jaccard_loss_ref(preds, targets, eps=1e-7):
    """Pure-JAX reference mirroring the PyTorch module."""
    B, C = preds.shape[0], preds.shape[1]
    p = jax.nn.sigmoid(preds.astype(jnp.float32)).reshape(B, C, -1)
    t = targets.astype(jnp.float32).reshape(B, C, -1)
    inter = jnp.sum(p * t, axis=2)
    union = jnp.sum(p, axis=2) + jnp.sum(t, axis=2) - inter
    jac = (inter + eps) / (union + eps)
    return 1.0 - jnp.mean(jac)


if __name__ == "__main__":
    key = jax.random.PRNGKey(0)
    k1, k2, k3, k4 = jax.random.split(key, 4)

    # Case 1: divisible shapes (N = 8 rows, L = 256 lanes), f32 inputs.
    B, C, H, W = 2, 4, 16, 16
    preds = jax.random.normal(k1, (B, C, H, W), dtype=jnp.float32)
    targets = (jax.random.uniform(k2, (B, C, H, W)) > 0.5).astype(jnp.float32)

    loss = jax.block_until_ready(jaccard_loss_pallas(preds, targets))
    ref = jax.block_until_ready(jaccard_loss_ref(preds, targets))
    assert jnp.allclose(loss, ref, atol=3e-5, rtol=1e-5), (loss, ref)

    # Case 2: non-divisible shapes (N=15, L=400 -> in-kernel lane masking,
    # partial row block) with bf16 preds + f32 targets (mixed-dtype sizing,
    # halved HBM traffic for the big operand).
    B2, C2, H2, W2 = 3, 5, 20, 20
    preds2 = jax.random.normal(k3, (B2, C2, H2, W2), dtype=jnp.float32)
    preds2 = preds2.astype(jnp.bfloat16)
    targets2 = (jax.random.uniform(k4, (B2, C2, H2, W2)) > 0.5).astype(jnp.float32)

    loss2 = jax.block_until_ready(jaccard_loss_pallas(preds2, targets2))
    ref2 = jax.block_until_ready(jaccard_loss_ref(preds2, targets2))
    assert jnp.allclose(loss2, ref2, atol=3e-5, rtol=1e-5), (loss2, ref2)

    print("KERNEL_OK")
</pallas_src>

<mosaic_0001>
module attributes {stable_mosaic.version = 11 : i64} {
  func.func @_jaccard_kernel(%arg0: i32, %arg1: i32, %arg2: memref<8x256xf32, #tpu.memory_space<vmem>>, %arg3: memref<8x256xf32, #tpu.memory_space<vmem>>, %arg4: memref<8x1xf32, #tpu.memory_space<vmem>>, %arg5: memref<8x1xf32, #tpu.memory_space<vmem>>, %arg6: memref<8x1xf32, #tpu.memory_space<vmem>>, %arg7: memref<8x1xf32, #tpu.memory_space<vmem>>) attributes {dimension_semantics = [#tpu.dimension_semantics<parallel>, #tpu.dimension_semantics<arbitrary>], iteration_bounds = array<i64: 1, 1>, scalar_prefetch = 0 : i64, scratch_operands = 3 : i64, tpu.core_type = #tpu.core_type<tc>, window_params = [{transform_indices = @transform_0, window_bounds = array<i64: 8, 256>}, {transform_indices = @transform_1, window_bounds = array<i64: 8, 256>}, {transform_indices = @transform_2, window_bounds = array<i64: 8, 1>}]} {
    %c0_i32 = arith.constant 0 : i32
    %0 = arith.cmpi eq, %arg1, %c0_i32 : i32
    %1 = arith.extui %0 : i1 to i32
    %c0_i32_0 = arith.constant 0 : i32
    %2 = arith.cmpi ne, %1, %c0_i32_0 : i32
    scf.if %2 {
      %cst_23 = arith.constant 0.000000e+00 : f32
      %31 = vector.broadcast %cst_23 : f32 to vector<8x1xf32>
      %c0_24 = arith.constant 0 : index
      %c0_25 = arith.constant 0 : index
      %32 = vector.load %arg5[%c0_24, %c0_25] : memref<8x1xf32, #tpu.memory_space<vmem>>, vector<8x1xf32>
      tpu.vector_store %arg5[%c0_24, %c0_25], %31 {strides = array<i32>} : memref<8x1xf32, #tpu.memory_space<vmem>>, vector<8x1xf32>,
      %cst_26 = arith.constant 0.000000e+00 : f32
      %33 = vector.broadcast %cst_26 : f32 to vector<8x1xf32>
      %c0_27 = arith.constant 0 : index
      %c0_28 = arith.constant 0 : index
      %34 = vector.load %arg6[%c0_27, %c0_28] : memref<8x1xf32, #tpu.memory_space<vmem>>, vector<8x1xf32>
      tpu.vector_store %arg6[%c0_27, %c0_28], %33 {strides = array<i32>} : memref<8x1xf32, #tpu.memory_space<vmem>>, vector<8x1xf32>,
      %cst_29 = arith.constant 0.000000e+00 : f32
      %35 = vector.broadcast %cst_29 : f32 to vector<8x1xf32>
      %c0_30 = arith.constant 0 : index
      %c0_31 = arith.constant 0 : index
      %36 = vector.load %arg7[%c0_30, %c0_31] : memref<8x1xf32, #tpu.memory_space<vmem>>, vector<8x1xf32>
      tpu.vector_store %arg7[%c0_30, %c0_31], %35 {strides = array<i32>} : memref<8x1xf32, #tpu.memory_space<vmem>>, vector<8x1xf32>,
    } else {
    }
    %c0 = arith.constant 0 : index
    %c0_1 = arith.constant 0 : index
    %3 = vector.load %arg2[%c0, %c0_1] : memref<8x256xf32, #tpu.memory_space<vmem>>, vector<8x256xf32>
    %c0_2 = arith.constant 0 : index
    %c0_3 = arith.constant 0 : index
    %4 = vector.load %arg3[%c0_2, %c0_3] : memref<8x256xf32, #tpu.memory_space<vmem>>, vector<8x256xf32>
    %cst = arith.constant 5.000000e-01 : f32
    %5 = vector.broadcast %cst : f32 to vector<8x256xf32>
    %6 = arith.mulf %5, %3 : vector<8x256xf32>
    %7 = math.tanh %6 : vector<8x256xf32>
    %cst_4 = arith.constant 5.000000e-01 : f32
    %8 = vector.broadcast %cst_4 : f32 to vector<8x256xf32>
    %9 = arith.mulf %8, %7 : vector<8x256xf32>
    %cst_5 = arith.constant 5.000000e-01 : f32
    %10 = vector.broadcast %cst_5 : f32 to vector<8x256xf32>
    %11 = arith.addf %9, %10 : vector<8x256xf32>
    %c0_6 = arith.constant 0 : index
    %c0_7 = arith.constant 0 : index
    %12 = vector.load %arg5[%c0_6, %c0_7] : memref<8x1xf32, #tpu.memory_space<vmem>>, vector<8x1xf32>
    %13 = arith.mulf %11, %4 : vector<8x256xf32>
    %cst_8 = arith.constant dense<0.000000e+00> : vector<8xf32>
    %14 = vector.multi_reduction <add>, %13, %cst_8 [1] : vector<8x256xf32> to vector<8xf32>
    %15 = vector.shape_cast %14 : vector<8xf32> to vector<8x1xf32>
    %16 = arith.addf %12, %15 : vector<8x1xf32>
    %c0_9 = arith.constant 0 : index
    %c0_10 = arith.constant 0 : index
    %17 = vector.load %arg5[%c0_9, %c0_10] : memref<8x1xf32, #tpu.memory_space<vmem>>, vector<8x1xf32>
    tpu.vector_store %arg5[%c0_9, %c0_10], %16 {strides = array<i32>} : memref<8x1xf32, #tpu.memory_space<vmem>>, vector<8x1xf32>,
    %c0_11 = arith.constant 0 : index
    %c0_12 = arith.constant 0 : index
    %18 = vector.load %arg6[%c0_11, %c0_12] : memref<8x1xf32, #tpu.memory_space<vmem>>, vector<8x1xf32>
    %cst_13 = arith.constant dense<0.000000e+00> : vector<8xf32>
    %19 = vector.multi_reduction <add>, %11, %cst_13 [1] : vector<8x256xf32> to vector<8xf32>
    %20 = vector.shape_cast %19 : vector<8xf32> to vector<8x1xf32>
    %21 = arith.addf %18, %20 : vector<8x1xf32>
    %c0_14 = arith.constant 0 : index
    %c0_15 = arith.constant 0 : index
    %22 = vector.load %arg6[%c0_14, %c0_15] : memref<8x1xf32, #tpu.memory_space<vmem>>, vector<8x1xf32>
    tpu.vector_store %arg6[%c0_14, %c0_15], %21 {strides = array<i32>} : memref<8x1xf32, #tpu.memory_space<vmem>>, vector<8x1xf32>,
    %c0_16 = arith.constant 0 : index
    %c0_17 = arith.constant 0 : index
    %23 = vector.load %arg7[%c0_16, %c0_17] : memref<8x1xf32, #tpu.memory_space<vmem>>, vector<8x1xf32>
    %cst_18 = arith.constant dense<0.000000e+00> : vector<8xf32>
    %24 = vector.multi_reduction <add>, %4, %cst_18 [1] : vector<8x256xf32> to vector<8xf32>
    %25 = vector.shape_cast %24 : vector<8xf32> to vector<8x1xf32>
    %26 = arith.addf %23, %25 : vector<8x1xf32>
    %c0_19 = arith.constant 0 : index
    %c0_20 = arith.constant 0 : index
    %27 = vector.load %arg7[%c0_19, %c0_20] : memref<8x1xf32, #tpu.memory_space<vmem>>, vector<8x1xf32>
    tpu.vector_store %arg7[%c0_19, %c0_20], %26 {strides = array<i32>} : memref<8x1xf32, #tpu.memory_space<vmem>>, vector<8x1xf32>,
    %c0_i32_21 = arith.constant 0 : i32
    %28 = arith.cmpi eq, %arg1, %c0_i32_21 : i32
    %29 = arith.extui %28 : i1 to i32
    %c0_i32_22 = arith.constant 0 : i32
    %30 = arith.cmpi ne, %29, %c0_i32_22 : i32
    scf.if %30 {
      %c0_23 = arith.constant 0 : index
      %c0_24 = arith.constant 0 : index
      %31 = vector.load %arg5[%c0_23, %c0_24] : memref<8x1xf32, #tpu.memory_space<vmem>>, vector<8x1xf32>
      %c0_25 = arith.constant 0 : index
      %c0_26 = arith.constant 0 : index
      %32 = vector.load %arg6[%c0_25, %c0_26] : memref<8x1xf32, #tpu.memory_space<vmem>>, vector<8x1xf32>
      %c0_27 = arith.constant 0 : index
      %c0_28 = arith.constant 0 : index
      %33 = vector.load %arg7[%c0_27, %c0_28] : memref<8x1xf32, #tpu.memory_space<vmem>>, vector<8x1xf32>
      %34 = arith.addf %32, %33 : vector<8x1xf32>
      %35 = arith.subf %34, %31 : vector<8x1xf32>
      %cst_29 = arith.constant 1.000000e-07 : f32
      %36 = vector.broadcast %cst_29 : f32 to vector<8x1xf32>
      %37 = arith.addf %31, %36 : vector<8x1xf32>
      %cst_30 = arith.constant 1.000000e-07 : f32
      %38 = vector.broadcast %cst_30 : f32 to vector<8x1xf32>
      %39 = arith.addf %35, %38 : vector<8x1xf32>
      %40 = arith.divf %37, %39 : vector<8x1xf32>
      %c0_31 = arith.constant 0 : index
      %c0_32 = arith.constant 0 : index
      %41 = vector.load %arg4[%c0_31, %c0_32] : memref<8x1xf32, #tpu.memory_space<vmem>>, vector<8x1xf32>
      tpu.vector_store %arg4[%c0_31, %c0_32], %40 {strides = array<i32>} : memref<8x1xf32, #tpu.memory_space<vmem>>, vector<8x1xf32>,
    } else {
    }
    return
  }
  func.func @transform_0(%arg0: i32, %arg1: i32) -> (i32, i32) {
    %c0_i32 = arith.constant 0 : i32
    return %arg0, %arg1 : i32, i32
  }
  func.func @transform_1(%arg0: i32, %arg1: i32) -> (i32, i32) {
    %c0_i32 = arith.constant 0 : i32
    return %arg0, %arg1 : i32, i32
  }
  func.func @transform_2(%arg0: i32, %arg1: i32) -> (i32, i32) {
    %c0_i32 = arith.constant 0 : i32
    %c0_i32_0 = arith.constant 0 : i32
    return %arg0, %c0_i32 : i32, i32
  }
}

</mosaic_0001>

<bundles_post_ra>
// kernel: tpu_custom_call.1
= control target key start
LH: loop header
LB: loop body
LE: loop exit
PB: predicated region body
PF: predicated region fallthrough
CT: control target
= control target key end

     0   :  { %7 = vsyncpa [#allocation6], 0  ;;  %s204_s0 = inlined_call_operand.hbm [shape: f32[8,256], index: 0, kind: input, shape index: {}]   ;;  %s205_s1 = inlined_call_operand.hbm [shape: f32[8,256], index: 1, kind: input, shape index: {}]   ;;  %s206_s2 = inlined_call_operand.vmem [shape: f32[8,1], index: 2, kind: output, shape index: {}]  }
   0x1   :  { %8 = vsyncpa [#allocation8], 0  ;;  %s152_s9 = smov [#allocation5]   ;;  %s153_s11 = smov [#allocation7]  }
   0x2   :  { %s15_s10 = sshll.u32 %s152_s9, 4  ;;  %s25_s12 = sshll.u32 %s153_s11, 4  ;;  %s16_s10 = int_to_ptr.vmem [resolvable:$true] %s15_s10  ;;  %s26_s12 = int_to_ptr.vmem [resolvable:$true] %s25_s12 }
   0x3   :  { %s104_s15 = scalar_lea.hbm %s204_s0, 256 }
   0x4   :  { %p105_p0 = scmp.ne.s32.totalorder %s204_s0, %s104_s15  ;;  %p108_p1 = scmp.lt.u32.totalorder %s104_s15, %s204_s0 }
   0x6   :  { %p110_p2 = pnand %p108_p1, %p105_p0 }
   0x8   :  { %113 = shalt.err (!%p110_p2)
}
   0x9   :  { %s114_s20 = scalar_lea.vmem %s16_s10, 256  ;;  %p119_p4 = scmp.lt.s32.totalorder %s16_s10, %s16_s10 }
   0xa   :  { %p115_p3 = scmp.ne.s32.totalorder %s16_s10, %s114_s20  ;;  %p120_p5 = scmp.lt.s32.totalorder %s114_s20, %s114_s20 }
   0xc   :  { %p121_p6 = por %p120_p5, %p119_p4 }
   0xe   :  { %p122_p7 = pnand %p121_p6, %p115_p3 }
  0x10   :  { %125 = shalt.err (!%p122_p7)
}
  0x11   :  { %18 = dma.hbm_to_vmem [thread:$0]  %s204_s0, 256, %s16_s10, [#allocation6]  }
  0x12   :  { %s126_s25 = scalar_lea.hbm %s205_s1, 256 }
  0x13   :  { %p127_p8 = scmp.ne.s32.totalorder %s205_s1, %s126_s25  ;;  %p130_p9 = scmp.lt.u32.totalorder %s126_s25, %s205_s1 }
  0x15   :  { %p132_p10 = pnand %p130_p9, %p127_p8 }
  0x17   :  { %135 = shalt.err (!%p132_p10)
}
  0x18   :  { %s136_s30 = scalar_lea.vmem %s26_s12, 256  ;;  %p141_p12 = scmp.lt.s32.totalorder %s26_s12, %s26_s12 }
  0x19   :  { %p137_p11 = scmp.ne.s32.totalorder %s26_s12, %s136_s30  ;;  %p142_p13 = scmp.lt.s32.totalorder %s136_s30, %s136_s30 }
  0x1b   :  { %p143_p0 = por %p142_p13, %p141_p12 }
  0x1d   :  { %p144_p1 = pnand %p143_p0, %p137_p11 }
  0x1f   :  { %147 = shalt.err (!%p144_p1)
}
  0x20   :  { %28 = dma.hbm_to_vmem [thread:$0]  %s205_s1, 256, %s26_s12, [#allocation8]  }
  0x21   :  { %148 = dma.done.wait [#allocation6], 256  }
  0x22   :  { %149 = vsyncadd [#allocation6], 4294967040 }
  0x23   :  { %150 = dma.done.wait [#allocation8], 256  }
  0x24   :  { %151 = vsyncadd [#allocation8], 4294967040  ;;  %vm39_vm0 = vcmask 7168   ;;  %v154_v0 = vmov 0.0   ;;  %v43_v1 = vld [vmem:[#allocation5] sm:$0xff]  ;;  %v44_v2 = vld [vmem:[#allocation5 + $0x8] sm:$0xff] }
  0x25   :  { %41 = vst.msk [vmem:[#allocation3] sm:$0xff] %vm39_vm0, %v154_v0  ;;  %40 = vst.msk [vmem:[#allocation2] sm:$0xff] %vm39_vm0, %v154_v0  ;;  %v47_v3 = vmul.f32 0.5, %v43_v1  ;;  %v48_v4 = vmul.f32 0.5, %v44_v2  ;;  %v45_v9 = vld [vmem:[#allocation7] sm:$0xff]  ;;  %v46_v11 = vld [vmem:[#allocation7 + $0x8] sm:$0xff] }
  0x26   :  { %42 = vst.msk [vmem:[#allocation4] sm:$0xff] %vm39_vm0, %v154_v0  ;;  %v71_v16 = vadd.f32 %v46_v11, %v45_v9 }
  0x27   :  { %98 = vtanh.f32 %v47_v3 }
  0x28   :  { %100 = vtanh.f32 %v48_v4 }
  0x2c   :  { %v64_v18 = vld [vmem:[#allocation3] sm:$0xff]  ;;  %v55_v20 = vld [vmem:[#allocation2] sm:$0xff] }
  0x2d   :  { %v70_v22 = vld [vmem:[#allocation4] sm:$0xff] }
  0x31   :  { %v99_v5 = vpop.eup %98 }
  0x32   :  { %v101_v6 = vpop.eup %100  ;;  %v51_v7 = vmul.f32 0.5, %v99_v5 }
  0x33   :  { %v52_v8 = vmul.f32 0.5, %v101_v6 }
  0x34   :  { %v53_v10 = vadd.f32 0.5, %v51_v7 }
  0x35   :  { %v54_v12 = vadd.f32 0.5, %v52_v8 }
  0x36   :  { %v56_v13 = vmul.f32 %v53_v10, %v45_v9 }
  0x37   :  { %v65_v14 = vadd.f32 %v54_v12, %v53_v10  ;;  %v57_v15 = vmul.f32 %v54_v12, %v46_v11 }
  0x39   :  { %66 = vadd.xlane.f32.xlu0 %v65_v14  ;;  %v58_v17 = vadd.f32 %v57_v15, %v56_v13 }
  0x3b   :  { %59 = vadd.xlane.f32.xlu1 %v58_v17 }
  0x3d   :  { %72 = vadd.xlane.f32.xlu0 %v71_v16 }
  0xc6   :  { %v67_v19 = vpop.xlane.xlu0 %66 }
  0xc7   :  { %v68_v21 = vadd.f32 %v67_v19, %v64_v18 }
  0xc8   :  { %v60_v23 = vpop.xlane.xlu1 %59 }
  0xc9   :  { %69 = vst.msk [vmem:[#allocation3] sm:$0xff] %vm39_vm0, %v68_v21  ;;  %v61_v24 = vadd.f32 %v60_v23, %v55_v20 }
  0xca   :  { %v73_v25 = vpop.xlane.xlu0 %72 }
  0xcb   :  { %v74_v26 = vadd.f32 %v73_v25, %v70_v22  ;;  %63 = vst.msk [vmem:[#allocation2] sm:$0xff] %vm39_vm0, %v61_v24 }
  0xcd   :  { %75 = vst.msk [vmem:[#allocation4] sm:$0xff] %vm39_vm0, %v74_v26 }
  0xd0   :  { %v80_v27 = vld [vmem:[#allocation3] sm:$0xff] }
  0xd2   :  { %v79_v29 = vld [vmem:[#allocation2] sm:$0xff] }
  0xd3   :  { %v84_v33 = vadd.f32 1e-07, %v79_v29 }
  0xd4   :  { %v81_v28 = vld [vmem:[#allocation4] sm:$0xff] }
  0xd5   :  { %v82_v30 = vadd.f32 %v81_v28, %v80_v27 }
  0xd7   :  { %v83_v31 = vsub.f32 %v82_v30, %v79_v29 }
  0xd9   :  { %v85_v32 = vadd.f32 1e-07, %v83_v31 }
  0xdb   :  { %102 = vrcp.f32 %v85_v32 }
  0xe5   :  { %v103_v34 = vpop.eup %102 }
  0xe6   :  { %v87_v35 = vmul.f32 %v103_v34, %v84_v33 }
  0xe8   :  { %88 = vst.msk [vmem:[%s206_s2] sm:$0xff] %vm39_vm0, %v87_v35 }
  0xe9   :  { %93 = vsyncpa [#allocation6], 1 }
  0xea   :  { %94 = vsyncpa [#allocation8], 1 }

</bundles_post_ra>
